<compile_context>
chip_gen: v7x
topology: tpu7x:2x2x1
jax: 0.10.0
libtpu: 0.0.40
codegen_flags: <defaults>
</compile_context>

<pallas_src>
import functools

import jax
import jax.numpy as jnp
from jax import lax
from jax.experimental import pallas as pl
from jax.experimental.pallas import tpu as pltpu

_LANES = 128


def _round_up(v, m):
    return ((v + m - 1) // m) * m


def _fcn_head_kernel(x_ref, w1_ref, shift_ref, w2_ref, b2_ref, o_ref, *, width, row_tile):
    # x_ref:     ((row_tile+2)*W, 3*Cin)  bf16  dx-packed rows incl. 2-row dy halo
    # w1_ref:    (3, 3*Cin, Km)           bf16  3x3 weights (BN scale folded), dy-major
    # shift_ref: (1, Km)                  f32   folded BN shift (beta - mean*scale), 0-padded
    # w2_ref:    (Km, Cn)                 bf16  1x1 conv weights, 0-padded
    # b2_ref:    (1, Cn)                  f32   1x1 conv bias, 0-padded
    # o_ref:     (row_tile*W, Cn)         f32   lane-dense output tile
    tm = row_tile * width
    km = w1_ref.shape[2]

    acc = jnp.zeros((tm, km), jnp.float32)
    # 3x3 conv as 3 contiguous bf16 MXU matmuls: dx folded into K, dy handled by a
    # sublane-aligned row offset into the haloed tile (no strided window relayouts).
    for dy in range(3):
        slab = x_ref[dy * width:dy * width + tm, :]
        acc = acc + jnp.dot(slab, w1_ref[dy], preferred_element_type=jnp.float32)

    # BatchNorm shift (scale already folded into w1) + ReLU.
    # Dropout(0.1) is identity at inference time.
    # TODO(synk): training-mode dropout (stochastic mask via pltpu.prng_*) not implemented.
    y = jnp.maximum(acc + shift_ref[...], 0.0)

    out = jnp.dot(y.astype(jnp.bfloat16), w2_ref[...], preferred_element_type=jnp.float32)
    o_ref[...] = (out + b2_ref[...]).astype(o_ref.dtype)


@functools.partial(jax.jit, static_argnames=("row_tile", "single_buffer_weights"))
def _fcn_head_call(x_nchw, w1, gamma, beta, run_mean, run_var, w2, b2, eps,
                   *, row_tile, single_buffer_weights):
    N, Cin, H, W = x_nchw.shape
    Cmid = w1.shape[0]          # w1: (Cmid, Cin, 3, 3) OIHW, no bias
    Cout = w2.shape[0]          # w2: (Cout, Cmid, 1, 1)
    assert H % row_tile == 0, (H, row_tile)
    n_row_tiles = H // row_tile
    Km = _round_up(Cmid, _LANES)   # lane-dense intermediate channels
    Cn = _round_up(Cout, _LANES)   # lane-dense output channels (unmasked vst)
    tm = row_tile * W
    tm_in = (row_tile + 2) * W

    # --- activations: NCHW -> NHWC, bf16, spatial pad, dx-pack (K=3*Cin), row tiles w/ halo.
    # NOTE: if the surrounding model is already NHWC, the transpose can be dropped (v5e).
    x = jnp.transpose(x_nchw.astype(jnp.bfloat16), (0, 2, 3, 1))        # (N,H,W,Cin)
    x = jnp.pad(x, ((0, 0), (1, 1), (1, 1), (0, 0)))                    # (N,H+2,W+2,Cin)
    xp = jnp.concatenate([x[:, :, dx:dx + W, :] for dx in range(3)], axis=-1)  # (N,H+2,W,3Cin)
    tiles = jnp.stack(
        [xp[:, r * row_tile:r * row_tile + row_tile + 2] for r in range(n_row_tiles)], axis=1)
    tiles = tiles.reshape(N, n_row_tiles, tm_in, 3 * Cin)               # (N,nR,(tH+2)*W,3Cin)

    # --- parameters: fold BN scale into w1, keep only shift; pad channel dims to 128.
    scale = gamma / jnp.sqrt(run_var + eps)
    shift = beta - run_mean * scale
    w1_p = jnp.transpose(w1, (2, 3, 1, 0)) * scale[None, None, None, :]  # (3,3,Cin,Cmid)
    w1_p = w1_p.reshape(3, 3 * Cin, Cmid)
    w1_p = jnp.pad(w1_p, ((0, 0), (0, 0), (0, Km - Cmid))).astype(jnp.bfloat16)
    shift_row = jnp.pad(shift, (0, Km - Cmid)).reshape(1, Km).astype(jnp.float32)
    w2_m = jnp.transpose(w2.reshape(Cout, Cmid), (1, 0))                 # (Cmid, Cout)
    w2_m = jnp.pad(w2_m, ((0, Km - Cmid), (0, Cn - Cout))).astype(jnp.bfloat16)
    b2_row = jnp.pad(b2, (0, Cn - Cout)).reshape(1, Cn).astype(jnp.float32)

    # Constant-index operands never change across the grid -> single buffer is enough.
    const_kw = {"pipeline_mode": pl.Buffered(1)} if single_buffer_weights else {}

    out_tiles = pl.pallas_call(
        functools.partial(_fcn_head_kernel, width=W, row_tile=row_tile),
        out_shape=jax.ShapeDtypeStruct((N, n_row_tiles, tm, Cn), jnp.float32),
        grid=(N, n_row_tiles),
        in_specs=[
            pl.BlockSpec((None, None, tm_in, 3 * Cin), lambda n, r: (n, r, 0, 0)),
            pl.BlockSpec((3, 3 * Cin, Km), lambda n, r: (0, 0, 0), **const_kw),
            pl.BlockSpec((1, Km), lambda n, r: (0, 0), **const_kw),
            pl.BlockSpec((Km, Cn), lambda n, r: (0, 0), **const_kw),
            pl.BlockSpec((1, Cn), lambda n, r: (0, 0), **const_kw),
        ],
        out_specs=pl.BlockSpec((None, None, tm, Cn), lambda n, r: (n, r, 0, 0)),
        compiler_params=pltpu.CompilerParams(
            dimension_semantics=("parallel", "parallel"),
            vmem_limit_bytes=48 * 1024 * 1024,
        ),
    )(tiles, w1_p, shift_row, w2_m, b2_row)

    out = out_tiles.reshape(N, n_row_tiles, row_tile, W, Cn)[..., :Cout]
    out = out.reshape(N, H, W, Cout)
    return jnp.transpose(out, (0, 3, 1, 2)).astype(x_nchw.dtype)       # back to NCHW


def fcn_head_forward(x_nchw, w1, gamma, beta, run_mean, run_var, w2, b2,
                     eps=1e-5, row_tile=None):
    """x_nchw: (N, Cin, H, W). Returns (N, Cout, H, W)."""
    H = x_nchw.shape[2]
    if row_tile is None:
        row_tile = H  # at production sizes pick row_tile so row_tile*W >= 256-512
    try:
        return _fcn_head_call(x_nchw, w1, gamma, beta, run_mean, run_var, w2, b2, eps,
                              row_tile=row_tile, single_buffer_weights=True)
    except Exception:
        # pl.Buffered(1) unsupported on this jax/libtpu build -> default double buffering.
        return _fcn_head_call(x_nchw, w1, gamma, beta, run_mean, run_var, w2, b2, eps,
                              row_tile=row_tile, single_buffer_weights=False)


def _reference_f32(x, w1, gamma, beta, run_mean, run_var, w2, b2, eps=1e-5):
    """Pure f32 reference (XLA convs), NCHW throughout."""
    y = lax.conv_general_dilated(x, w1, (1, 1), ((1, 1), (1, 1)),
                                 dimension_numbers=("NCHW", "OIHW", "NCHW"),
                                 precision=lax.Precision.HIGHEST)
    inv = 1.0 / jnp.sqrt(run_var + eps)
    y = (y - run_mean[None, :, None, None]) * (gamma * inv)[None, :, None, None] \
        + beta[None, :, None, None]
    y = jnp.maximum(y, 0.0)
    y = lax.conv_general_dilated(y, w2, (1, 1), ((0, 0), (0, 0)),
                                 dimension_numbers=("NCHW", "OIHW", "NCHW"),
                                 precision=lax.Precision.HIGHEST)
    return y + b2[None, :, None, None]


def _reference_bf16_matched(x, w1, gamma, beta, run_mean, run_var, w2, b2, eps=1e-5):
    """Same numerics as the kernel (bf16 operands, f32 accumulate), via XLA convs."""
    f32 = jnp.float32
    scale = gamma / jnp.sqrt(run_var + eps)
    shift = beta - run_mean * scale
    xb = x.astype(jnp.bfloat16).astype(f32)
    w1b = (w1 * scale[:, None, None, None]).astype(jnp.bfloat16).astype(f32)
    y = lax.conv_general_dilated(xb, w1b, (1, 1), ((1, 1), (1, 1)),
                                 dimension_numbers=("NCHW", "OIHW", "NCHW"),
                                 precision=lax.Precision.HIGHEST)
    y = jnp.maximum(y + shift[None, :, None, None], 0.0)
    yb = y.astype(jnp.bfloat16).astype(f32)
    w2b = w2.astype(jnp.bfloat16).astype(f32)
    out = lax.conv_general_dilated(yb, w2b, (1, 1), ((0, 0), (0, 0)),
                                   dimension_numbers=("NCHW", "OIHW", "NCHW"),
                                   precision=lax.Precision.HIGHEST)
    return out + b2[None, :, None, None]


if __name__ == "__main__":
    # Small, module-consistent shapes: in_channels=16 -> inter_channels=4, channels=8.
    N, Cin, H, W = 2, 16, 16, 16
    Cmid = Cin // 4
    Cout = 8

    key = jax.random.PRNGKey(0)
    ks = jax.random.split(key, 7)
    x = jax.random.normal(ks[0], (N, Cin, H, W), jnp.float32)

    w1 = 0.1 * jax.random.normal(ks[1], (Cmid, Cin, 3, 3), jnp.float32)   # conv1, no bias
    gamma = 1.0 + 0.1 * jax.random.normal(ks[2], (Cmid,), jnp.float32)    # BN weight
    beta = 0.1 * jax.random.normal(ks[3], (Cmid,), jnp.float32)           # BN bias
    run_mean = 0.05 * jax.random.normal(ks[4], (Cmid,), jnp.float32)      # BN running_mean
    run_var = jnp.abs(1.0 + 0.1 * jax.random.normal(ks[5], (Cmid,), jnp.float32))
    w2 = 0.1 * jax.random.normal(ks[6], (Cout, Cmid, 1, 1), jnp.float32)  # conv2 (1x1)
    b2 = 0.01 * jnp.arange(Cout, dtype=jnp.float32)                       # conv2 bias

    ref_b = jax.block_until_ready(
        _reference_bf16_matched(x, w1, gamma, beta, run_mean, run_var, w2, b2))
    ref_f = jax.block_until_ready(
        _reference_f32(x, w1, gamma, beta, run_mean, run_var, w2, b2))

    # Exercise both the multi-row-tile (halo) path and the single-tile path.
    for rt in (8, 16):
        out = fcn_head_forward(x, w1, gamma, beta, run_mean, run_var, w2, b2, row_tile=rt)
        out = jax.block_until_ready(out)
        assert out.shape == (N, Cout, H, W), out.shape
        # Exact-path check (bf16 operands, f32 accumulate) -> tight tolerance.
        assert jnp.allclose(out, ref_b, atol=1e-4, rtol=1e-4), \
            (rt, float(jnp.max(jnp.abs(out - ref_b))))
        # Sanity vs. pure-f32 math: only bf16 rounding differences expected.
        assert float(jnp.max(jnp.abs(out - ref_f))) < 0.1

    print("KERNEL_OK")
</pallas_src>

<mosaic_0001>
module attributes {stable_mosaic.version = 11 : i64} {
  func.func @_fcn_head_kernel(%arg0: i32, %arg1: i32, %arg2: memref<1x1x160x48xbf16, #tpu.memory_space<vmem>>, %arg3: memref<3x48x128xbf16, #tpu.memory_space<vmem>>, %arg4: memref<1x128xf32, #tpu.memory_space<vmem>>, %arg5: memref<128x128xbf16, #tpu.memory_space<vmem>>, %arg6: memref<1x128xf32, #tpu.memory_space<vmem>>, %arg7: memref<1x1x128x128xf32, #tpu.memory_space<vmem>>) attributes {dimension_semantics = [#tpu.dimension_semantics<parallel>, #tpu.dimension_semantics<parallel>], iteration_bounds = array<i64: 2, 2>, scalar_prefetch = 0 : i64, scratch_operands = 0 : i64, tpu.core_type = #tpu.core_type<tc>, window_params = [{transform_indices = @transform_0, window_bounds = array<i64: 1, 1, 160, 48>}, {pipeline_mode = #tpu.pipeline_mode<synchronous>, transform_indices = @transform_1, window_bounds = array<i64: 3, 48, 128>}, {pipeline_mode = #tpu.pipeline_mode<synchronous>, transform_indices = @transform_2, window_bounds = array<i64: 1, 128>}, {pipeline_mode = #tpu.pipeline_mode<synchronous>, transform_indices = @transform_3, window_bounds = array<i64: 128, 128>}, {pipeline_mode = #tpu.pipeline_mode<synchronous>, transform_indices = @transform_4, window_bounds = array<i64: 1, 128>}, {transform_indices = @transform_5, window_bounds = array<i64: 1, 1, 128, 128>}]} {
    %cst = arith.constant 0.000000e+00 : f32
    %0 = vector.broadcast %cst : f32 to vector<128x128xf32>
    %c0 = arith.constant 0 : index
    %c0_0 = arith.constant 0 : index
    %c0_1 = arith.constant 0 : index
    %c0_2 = arith.constant 0 : index
    %1 = vector.load %arg2[%c0, %c0_0, %c0_1, %c0_2] : memref<1x1x160x48xbf16, #tpu.memory_space<vmem>>, vector<1x1x128x48xbf16>
    %2 = vector.shape_cast %1 : vector<1x1x128x48xbf16> to vector<128x48xbf16>
    %c0_3 = arith.constant 0 : index
    %c0_4 = arith.constant 0 : index
    %c0_5 = arith.constant 0 : index
    %3 = vector.load %arg3[%c0_3, %c0_4, %c0_5] : memref<3x48x128xbf16, #tpu.memory_space<vmem>>, vector<1x48x128xbf16>
    %4 = vector.shape_cast %3 : vector<1x48x128xbf16> to vector<48x128xbf16>
    %cst_6 = arith.constant dense<0.000000e+00> : vector<128x128xf32>
    %5 = tpu.matmul %2, %4, %cst_6 {dimension_numbers = #tpu.dot_dimension_numbers<[1], [0], [0], [1], [0, 0, 1, 1], [], []>} : vector<128x48xbf16>, vector<48x128xbf16>, vector<128x128xf32> -> vector<128x128xf32>
    %6 = arith.addf %0, %5 : vector<128x128xf32>
    %c0_7 = arith.constant 0 : index
    %c0_8 = arith.constant 0 : index
    %c16 = arith.constant 16 : index
    %c0_9 = arith.constant 0 : index
    %7 = vector.load %arg2[%c0_7, %c0_8, %c16, %c0_9] : memref<1x1x160x48xbf16, #tpu.memory_space<vmem>>, vector<1x1x128x48xbf16>
    %8 = vector.shape_cast %7 : vector<1x1x128x48xbf16> to vector<128x48xbf16>
    %c1 = arith.constant 1 : index
    %c0_10 = arith.constant 0 : index
    %c0_11 = arith.constant 0 : index
    %9 = vector.load %arg3[%c1, %c0_10, %c0_11] : memref<3x48x128xbf16, #tpu.memory_space<vmem>>, vector<1x48x128xbf16>
    %10 = vector.shape_cast %9 : vector<1x48x128xbf16> to vector<48x128xbf16>
    %cst_12 = arith.constant dense<0.000000e+00> : vector<128x128xf32>
    %11 = tpu.matmul %8, %10, %cst_12 {dimension_numbers = #tpu.dot_dimension_numbers<[1], [0], [0], [1], [0, 0, 1, 1], [], []>} : vector<128x48xbf16>, vector<48x128xbf16>, vector<128x128xf32> -> vector<128x128xf32>
    %12 = arith.addf %6, %11 : vector<128x128xf32>
    %c0_13 = arith.constant 0 : index
    %c0_14 = arith.constant 0 : index
    %c32 = arith.constant 32 : index
    %c0_15 = arith.constant 0 : index
    %13 = vector.load %arg2[%c0_13, %c0_14, %c32, %c0_15] : memref<1x1x160x48xbf16, #tpu.memory_space<vmem>>, vector<1x1x128x48xbf16>
    %14 = vector.shape_cast %13 : vector<1x1x128x48xbf16> to vector<128x48xbf16>
    %c2 = arith.constant 2 : index
    %c0_16 = arith.constant 0 : index
    %c0_17 = arith.constant 0 : index
    %15 = vector.load %arg3[%c2, %c0_16, %c0_17] : memref<3x48x128xbf16, #tpu.memory_space<vmem>>, vector<1x48x128xbf16>
    %16 = vector.shape_cast %15 : vector<1x48x128xbf16> to vector<48x128xbf16>
    %cst_18 = arith.constant dense<0.000000e+00> : vector<128x128xf32>
    %17 = tpu.matmul %14, %16, %cst_18 {dimension_numbers = #tpu.dot_dimension_numbers<[1], [0], [0], [1], [0, 0, 1, 1], [], []>} : vector<128x48xbf16>, vector<48x128xbf16>, vector<128x128xf32> -> vector<128x128xf32>
    %18 = arith.addf %12, %17 : vector<128x128xf32>
    %c0_19 = arith.constant 0 : index
    %c0_20 = arith.constant 0 : index
    %19 = vector.load %arg4[%c0_19, %c0_20] : memref<1x128xf32, #tpu.memory_space<vmem>>, vector<1x128xf32>
    %20 = vector.broadcast %19 : vector<1x128xf32> to vector<128x128xf32>
    %21 = arith.addf %18, %20 : vector<128x128xf32>
    %cst_21 = arith.constant 0.000000e+00 : f32
    %22 = vector.broadcast %cst_21 : f32 to vector<128x128xf32>
    %23 = arith.maximumf %21, %22 : vector<128x128xf32>
    %24 = arith.truncf %23 : vector<128x128xf32> to vector<128x128xbf16>
    %c0_22 = arith.constant 0 : index
    %c0_23 = arith.constant 0 : index
    %25 = vector.load %arg5[%c0_22, %c0_23] : memref<128x128xbf16, #tpu.memory_space<vmem>>, vector<128x128xbf16>
    %cst_24 = arith.constant dense<0.000000e+00> : vector<128x128xf32>
    %26 = tpu.matmul %24, %25, %cst_24 {dimension_numbers = #tpu.dot_dimension_numbers<[1], [0], [0], [1], [0, 0, 1, 1], [], []>} : vector<128x128xbf16>, vector<128x128xbf16>, vector<128x128xf32> -> vector<128x128xf32>
    %c0_25 = arith.constant 0 : index
    %c0_26 = arith.constant 0 : index
    %27 = vector.load %arg6[%c0_25, %c0_26] : memref<1x128xf32, #tpu.memory_space<vmem>>, vector<1x128xf32>
    %28 = vector.broadcast %27 : vector<1x128xf32> to vector<128x128xf32>
    %29 = arith.addf %26, %28 : vector<128x128xf32>
    %c0_27 = arith.constant 0 : index
    %c0_28 = arith.constant 0 : index
    %c0_29 = arith.constant 0 : index
    %c0_30 = arith.constant 0 : index
    %30 = vector.load %arg7[%c0_27, %c0_28, %c0_29, %c0_30] : memref<1x1x128x128xf32, #tpu.memory_space<vmem>>, vector<1x1x128x128xf32>
    %31 = vector.shape_cast %30 : vector<1x1x128x128xf32> to vector<128x128xf32>
    %32 = vector.shape_cast %29 : vector<128x128xf32> to vector<1x1x128x128xf32>
    tpu.vector_store %arg7[%c0_27, %c0_28, %c0_29, %c0_30], %32 {strides = array<i32>} : memref<1x1x128x128xf32, #tpu.memory_space<vmem>>, vector<1x1x128x128xf32>,
    return
  }
  func.func @transform_0(%arg0: i32, %arg1: i32) -> (i32, i32, i32, i32) {
    %c0_i32 = arith.constant 0 : i32
    %c0_i32_0 = arith.constant 0 : i32
    %c0_i32_1 = arith.constant 0 : i32
    return %arg0, %arg1, %c0_i32, %c0_i32_0 : i32, i32, i32, i32
  }
  func.func @transform_1(%arg0: i32, %arg1: i32) -> (i32, i32, i32) {
    %c0_i32 = arith.constant 0 : i32
    %c0_i32_0 = arith.constant 0 : i32
    %c0_i32_1 = arith.constant 0 : i32
    %c0_i32_2 = arith.constant 0 : i32
    return %c0_i32, %c0_i32_0, %c0_i32_1 : i32, i32, i32
  }
  func.func @transform_2(%arg0: i32, %arg1: i32) -> (i32, i32) {
    %c0_i32 = arith.constant 0 : i32
    %c0_i32_0 = arith.constant 0 : i32
    %c0_i32_1 = arith.constant 0 : i32
    return %c0_i32, %c0_i32_0 : i32, i32
  }
  func.func @transform_3(%arg0: i32, %arg1: i32) -> (i32, i32) {
    %c0_i32 = arith.constant 0 : i32
    %c0_i32_0 = arith.constant 0 : i32
    %c0_i32_1 = arith.constant 0 : i32
    return %c0_i32, %c0_i32_0 : i32, i32
  }
  func.func @transform_4(%arg0: i32, %arg1: i32) -> (i32, i32) {
    %c0_i32 = arith.constant 0 : i32
    %c0_i32_0 = arith.constant 0 : i32
    %c0_i32_1 = arith.constant 0 : i32
    return %c0_i32, %c0_i32_0 : i32, i32
  }
  func.func @transform_5(%arg0: i32, %arg1: i32) -> (i32, i32, i32, i32) {
    %c0_i32 = arith.constant 0 : i32
    %c0_i32_0 = arith.constant 0 : i32
    %c0_i32_1 = arith.constant 0 : i32
    return %arg0, %arg1, %c0_i32, %c0_i32_0 : i32, i32, i32, i32
  }
}

module attributes {stable_mosaic.version = 11 : i64} {
  func.func @_fcn_head_kernel(%arg0: i32, %arg1: i32, %arg2: memref<1x1x160x48xbf16, #tpu.memory_space<vmem>>, %arg3: memref<3x48x128xbf16, #tpu.memory_space<vmem>>, %arg4: memref<1x128xf32, #tpu.memory_space<vmem>>, %arg5: memref<128x128xbf16, #tpu.memory_space<vmem>>, %arg6: memref<1x128xf32, #tpu.memory_space<vmem>>, %arg7: memref<1x1x128x128xf32, #tpu.memory_space<vmem>>) attributes {dimension_semantics = [#tpu.dimension_semantics<parallel>, #tpu.dimension_semantics<parallel>], iteration_bounds = array<i64: 2, 2>, scalar_prefetch = 0 : i64, scratch_operands = 0 : i64, tpu.core_type = #tpu.core_type<tc>, window_params = [{transform_indices = @transform_0, window_bounds = array<i64: 1, 1, 160, 48>}, {pipeline_mode = #tpu.pipeline_mode<synchronous>, transform_indices = @transform_1, window_bounds = array<i64: 3, 48, 128>}, {pipeline_mode = #tpu.pipeline_mode<synchronous>, transform_indices = @transform_2, window_bounds = array<i64: 1, 128>}, {pipeline_mode = #tpu.pipeline_mode<synchronous>, transform_indices = @transform_3, window_bounds = array<i64: 128, 128>}, {pipeline_mode = #tpu.pipeline_mode<synchronous>, transform_indices = @transform_4, window_bounds = array<i64: 1, 128>}, {transform_indices = @transform_5, window_bounds = array<i64: 1, 1, 128, 128>}]} {
    %cst = arith.constant 0.000000e+00 : f32
    %0 = vector.broadcast %cst : f32 to vector<128x128xf32>
    %c0 = arith.constant 0 : index
    %c0_0 = arith.constant 0 : index
    %c0_1 = arith.constant 0 : index
    %c0_2 = arith.constant 0 : index
    %1 = vector.load %arg2[%c0, %c0_0, %c0_1, %c0_2] : memref<1x1x160x48xbf16, #tpu.memory_space<vmem>>, vector<1x1x128x48xbf16>
    %2 = vector.shape_cast %1 : vector<1x1x128x48xbf16> to vector<128x48xbf16>
    %c0_3 = arith.constant 0 : index
    %c0_4 = arith.constant 0 : index
    %c0_5 = arith.constant 0 : index
    %3 = vector.load %arg3[%c0_3, %c0_4, %c0_5] : memref<3x48x128xbf16, #tpu.memory_space<vmem>>, vector<1x48x128xbf16>
    %4 = vector.shape_cast %3 : vector<1x48x128xbf16> to vector<48x128xbf16>
    %cst_6 = arith.constant dense<0.000000e+00> : vector<128x128xf32>
    %5 = tpu.matmul %2, %4, %cst_6 {dimension_numbers = #tpu.dot_dimension_numbers<[1], [0], [0], [1], [0, 0, 1, 1], [], []>} : vector<128x48xbf16>, vector<48x128xbf16>, vector<128x128xf32> -> vector<128x128xf32>
    %6 = arith.addf %0, %5 : vector<128x128xf32>
    %c0_7 = arith.constant 0 : index
    %c0_8 = arith.constant 0 : index
    %c16 = arith.constant 16 : index
    %c0_9 = arith.constant 0 : index
    %7 = vector.load %arg2[%c0_7, %c0_8, %c16, %c0_9] : memref<1x1x160x48xbf16, #tpu.memory_space<vmem>>, vector<1x1x128x48xbf16>
    %8 = vector.shape_cast %7 : vector<1x1x128x48xbf16> to vector<128x48xbf16>
    %c1 = arith.constant 1 : index
    %c0_10 = arith.constant 0 : index
    %c0_11 = arith.constant 0 : index
    %9 = vector.load %arg3[%c1, %c0_10, %c0_11] : memref<3x48x128xbf16, #tpu.memory_space<vmem>>, vector<1x48x128xbf16>
    %10 = vector.shape_cast %9 : vector<1x48x128xbf16> to vector<48x128xbf16>
    %cst_12 = arith.constant dense<0.000000e+00> : vector<128x128xf32>
    %11 = tpu.matmul %8, %10, %cst_12 {dimension_numbers = #tpu.dot_dimension_numbers<[1], [0], [0], [1], [0, 0, 1, 1], [], []>} : vector<128x48xbf16>, vector<48x128xbf16>, vector<128x128xf32> -> vector<128x128xf32>
    %12 = arith.addf %6, %11 : vector<128x128xf32>
    %c0_13 = arith.constant 0 : index
    %c0_14 = arith.constant 0 : index
    %c32 = arith.constant 32 : index
    %c0_15 = arith.constant 0 : index
    %13 = vector.load %arg2[%c0_13, %c0_14, %c32, %c0_15] : memref<1x1x160x48xbf16, #tpu.memory_space<vmem>>, vector<1x1x128x48xbf16>
    %14 = vector.shape_cast %13 : vector<1x1x128x48xbf16> to vector<128x48xbf16>
    %c2 = arith.constant 2 : index
    %c0_16 = arith.constant 0 : index
    %c0_17 = arith.constant 0 : index
    %15 = vector.load %arg3[%c2, %c0_16, %c0_17] : memref<3x48x128xbf16, #tpu.memory_space<vmem>>, vector<1x48x128xbf16>
    %16 = vector.shape_cast %15 : vector<1x48x128xbf16> to vector<48x128xbf16>
    %cst_18 = arith.constant dense<0.000000e+00> : vector<128x128xf32>
    %17 = tpu.matmul %14, %16, %cst_18 {dimension_numbers = #tpu.dot_dimension_numbers<[1], [0], [0], [1], [0, 0, 1, 1], [], []>} : vector<128x48xbf16>, vector<48x128xbf16>, vector<128x128xf32> -> vector<128x128xf32>
    %18 = arith.addf %12, %17 : vector<128x128xf32>
    %c0_19 = arith.constant 0 : index
    %c0_20 = arith.constant 0 : index
    %19 = vector.load %arg4[%c0_19, %c0_20] : memref<1x128xf32, #tpu.memory_space<vmem>>, vector<1x128xf32>
    %20 = vector.broadcast %19 : vector<1x128xf32> to vector<128x128xf32>
    %21 = arith.addf %18, %20 : vector<128x128xf32>
    %cst_21 = arith.constant 0.000000e+00 : f32
    %22 = vector.broadcast %cst_21 : f32 to vector<128x128xf32>
    %23 = arith.maximumf %21, %22 : vector<128x128xf32>
    %24 = arith.truncf %23 : vector<128x128xf32> to vector<128x128xbf16>
    %c0_22 = arith.constant 0 : index
    %c0_23 = arith.constant 0 : index
    %25 = vector.load %arg5[%c0_22, %c0_23] : memref<128x128xbf16, #tpu.memory_space<vmem>>, vector<128x128xbf16>
    %cst_24 = arith.constant dense<0.000000e+00> : vector<128x128xf32>
    %26 = tpu.matmul %24, %25, %cst_24 {dimension_numbers = #tpu.dot_dimension_numbers<[1], [0], [0], [1], [0, 0, 1, 1], [], []>} : vector<128x128xbf16>, vector<128x128xbf16>, vector<128x128xf32> -> vector<128x128xf32>
    %c0_25 = arith.constant 0 : index
    %c0_26 = arith.constant 0 : index
    %27 = vector.load %arg6[%c0_25, %c0_26] : memref<1x128xf32, #tpu.memory_space<vmem>>, vector<1x128xf32>
    %28 = vector.broadcast %27 : vector<1x128xf32> to vector<128x128xf32>
    %29 = arith.addf %26, %28 : vector<128x128xf32>
    %c0_27 = arith.constant 0 : index
    %c0_28 = arith.constant 0 : index
    %c0_29 = arith.constant 0 : index
    %c0_30 = arith.constant 0 : index
    %30 = vector.load %arg7[%c0_27, %c0_28, %c0_29, %c0_30] : memref<1x1x128x128xf32, #tpu.memory_space<vmem>>, vector<1x1x128x128xf32>
    %31 = vector.shape_cast %30 : vector<1x1x128x128xf32> to vector<128x128xf32>
    %32 = vector.shape_cast %29 : vector<128x128xf32> to vector<1x1x128x128xf32>
    tpu.vector_store %arg7[%c0_27, %c0_28, %c0_29, %c0_30], %32 {strides = array<i32>} : memref<1x1x128x128xf32, #tpu.memory_space<vmem>>, vector<1x1x128x128xf32>,
    return
  }
  func.func @transform_0(%arg0: i32, %arg1: i32) -> (i32, i32, i32, i32) {
    %c0_i32 = arith.constant 0 : i32
    %c0_i32_0 = arith.constant 0 : i32
    %c0_i32_1 = arith.constant 0 : i32
    return %arg0, %arg1, %c0_i32, %c0_i32_0 : i32, i32, i32, i32
  }
  func.func @transform_1(%arg0: i32, %arg1: i32) -> (i32, i32, i32) {
    %c0_i32 = arith.constant 0 : i32
    %c0_i32_0 = arith.constant 0 : i32
    %c0_i32_1 = arith.constant 0 : i32
    %c0_i32_2 = arith.constant 0 : i32
    return %c0_i32, %c0_i32_0, %c0_i32_1 : i32, i32, i32
  }
  func.func @transform_2(%arg0: i32, %arg1: i32) -> (i32, i32) {
    %c0_i32 = arith.constant 0 : i32
    %c0_i32_0 = arith.constant 0 : i32
    %c0_i32_1 = arith.constant 0 : i32
    return %c0_i32, %c0_i32_0 : i32, i32
  }
  func.func @transform_3(%arg0: i32, %arg1: i32) -> (i32, i32) {
    %c0_i32 = arith.constant 0 : i32
    %c0_i32_0 = arith.constant 0 : i32
    %c0_i32_1 = arith.constant 0 : i32
    return %c0_i32, %c0_i32_0 : i32, i32
  }
  func.func @transform_4(%arg0: i32, %arg1: i32) -> (i32, i32) {
    %c0_i32 = arith.constant 0 : i32
    %c0_i32_0 = arith.constant 0 : i32
    %c0_i32_1 = arith.constant 0 : i32
    return %c0_i32, %c0_i32_0 : i32, i32
  }
  func.func @transform_5(%arg0: i32, %arg1: i32) -> (i32, i32, i32, i32) {
    %c0_i32 = arith.constant 0 : i32
    %c0_i32_0 = arith.constant 0 : i32
    %c0_i32_1 = arith.constant 0 : i32
    return %arg0, %arg1, %c0_i32, %c0_i32_0 : i32, i32, i32, i32
  }
}

</mosaic_0001>

<bundles_post_ra>
// kernel: _fcn_head_call.1
= control target key start
LH: loop header
LB: loop body
LE: loop exit
PB: predicated region body
PF: predicated region fallthrough
CT: control target
= control target key end

     0   :  { %s1548_s18 = smov 0   ;;  %s1550_s19 = smov 0   ;;  %s1752_s0 = inlined_call_operand.vmem [shape: bf16[2,2,160,48], index: 0, kind: input, shape index: {}]   ;;  %s1753_s1 = inlined_call_operand.vmem [shape: bf16[3,48,128], index: 1, kind: input, shape index: {}]   ;;  %s1754_s2 = inlined_call_operand.vmem [shape: f32[1,128], index: 2, kind: input, shape index: {}]   ;;  %s1755_s3 = inlined_call_operand.vmem [shape: bf16[128,128], index: 3, kind: input, shape index: {}]   ;;  %s1756_s4 = inlined_call_operand.vmem [shape: f32[1,128], index: 4, kind: input, shape index: {}]   ;;  %s1757_s5 = inlined_call_operand.vmem [shape: f32[2,2,128,128], index: 5, kind: output, shape index: {}]  }
   0x1   :  { %s1552_s20 = smov 0   ;;  %s1554_s21 = smov 0  }
   0x2   :  { %s1556_s22 = smov 0  }
   0x3 LB: > { %s24_s23 = sadd.s32 1, %s1508_s20  ;;  %s27_s24 = sadd.s32 1, %s1512_s21  ;;  %s1516_s22 = sphi %s1556_s22, %s15_s22   ;;  %s1512_s21 = sphi %s1554_s21, %s1761_s21   ;;  %s1508_s20 = sphi %s1552_s20, %s1760_s20   ;;  %s1504_s19 = sphi %s1550_s19, %s1759_s19   ;;  %s1500_s18 = sphi %s1548_s18, %s1758_s18  }
   0x4   : > { %p25_p0 = scmp.ge.s32.totalorder %s24_s23, 2  ;;  %p1144_p1 = scmp.ge.s32.totalorder %s1516_s22, 1 }
   0x5   : > { %p207_p2 = scmp.lt.s32.totalorder %s1516_s22, 5 }
   0x6   : > { %s1763_s23 = smov (%p25_p0, %s24_s23), 0  ;;  %s1765_s24 = smov (!%p25_p0, %s27_s24), %s1512_s21 }
   0x7   : > { %p208_p3 = pnand %p1144_p1, %p207_p2  ;;  %p29_p4 = scmp.ge.s32.totalorder %s1765_s24, 2 }
   0x8   : > { %v1444_v0 = vld [vmem:[%s1753_s1] sm:$0xff] (!%p208_p3)   ;;  %p243_p5 = scmp.lt.s32.totalorder (!%p208_p3), %s1504_s19, 1  ;;  %v1445_v1 = vld [vmem:[%s1753_s1 + $0x8] sm:$0xff] (!%p208_p3)   ;;  %p245_p6 = scmp.lt.s32.totalorder (!%p208_p3), %s1500_s18, 1  ;;  %v1446_v2 = vld [vmem:[%s1753_s1 + $0x10] sm:$0xff] (!%p208_p3)   ;;  %vm351_vm0 = vcmask (!%p208_p3), 392192  }
   0x9   : > { %s1767_s24 = smov (%p29_p4, %s1765_s24), 0  ;;  %211 = sbr.rel (%p208_p3) target bundleno = 523 (0x20b), region = 40 }
   0xa   : > { %1294 = vmatprep.subr.bf16.mxu0 (!%p208_p3), %v1444_v0  ;;  %v1455_v3 = vld [vmem:[%s1753_s1 + $0x18] sm:$0xff] (!%p208_p3)   ;;  %v1456_v4 = vld [vmem:[%s1753_s1 + $0x20] sm:$0xff] (!%p208_p3)   ;;  %v1449_v5 = vld [vmem:[%s1753_s1 + $0x30] sm:$0xff] (!%p208_p3)  }
   0xb   : > { %1295 = vmatpush3.bf16.msra.mxu0 (!%p208_p3), %v1444_v0  ;;  %1272 = vmatprep.subr.bf16.mxu1 (!%p208_p3), %v1455_v3  ;;  %v1460_v6 = vld [vmem:[%s1753_s1 + $0x28] sm:$0xff] (!%p208_p3)   ;;  %v1452_v8 = vld [vmem:[%s1753_s1 + $0x38] sm:$0xff] (!%p208_p3)   ;;  %v1457_v11 = vld [vmem:[%s1753_s1 + $0x40] sm:$0xff] (!%p208_p3)  }
   0xc   : > { %1296 = vmatprep.subr.bf16.mxu0 (!%p208_p3), %v1445_v1  ;;  %1273 = vmatpush3.bf16.msra.mxu1 (!%p208_p3), %v1455_v3  ;;  %v1470_v16 = vld [vmem:[%s1755_s3] sm:$0xff] (!%p208_p3)   ;;  %v1471_v17 = vld [vmem:[%s1755_s3 + $0x8] sm:$0xff] (!%p208_p3)   ;;  %v1472_v18 = vld [vmem:[%s1755_s3 + $0x10] sm:$0xff] (!%p208_p3)  }
   0xd   : > { %1274 = vmatprep.subr.bf16.mxu1 (!%p208_p3), %v1456_v4  ;;  %v1473_v21 = vld [vmem:[%s1755_s3 + $0x18] sm:$0xff] (!%p208_p3)   ;;  %v1474_v22 = vld [vmem:[%s1755_s3 + $0x20] sm:$0xff] (!%p208_p3)   ;;  %v1475_v31 = vld [vmem:[%s1755_s3 + $0x28] sm:$0xff] (!%p208_p3)  }
   0xe   : > { %v1476_v32 = vld [vmem:[%s1755_s3 + $0x30] sm:$0xff] (!%p208_p3)   ;;  %v1477_v33 = vld [vmem:[%s1755_s3 + $0x38] sm:$0xff] (!%p208_p3)   ;;  %v1686_v49 = vld [vmem:[%s1754_s2] ss:$0 sm:$0xff] (!%p208_p3) }
   0xf   : > { %1297 = vmatpush3.bf16.msra.mxu0 (!%p208_p3), %v1445_v1 }
  0x10   : > { %s1769_s19 = smov (!%p243_p5, %s1504_s19), 1  ;;  %s1771_s18 = smov (!%p245_p6, %s1500_s18), 1  ;;  %1298 = vmatprep.subr.bf16.mxu0 %v1446_v2  ;;  %1275 = vmatpush3.bf16.msra.mxu1 %v1456_v4 }
  0x11   : > { %s1403_s6 = smul.u32 40, %s1769_s19  ;;  %1276 = vmatprep.subr.bf16.mxu1 %v1460_v6  ;;  %s1147_s8 = sshll.u32 %s1769_s19, 5 }
  0x12   : > { %s1402_s7 = smul.u32 20, %s1771_s18 }
  0x13   : > { %1299 = vmatpush3.bf16.msra.mxu0 %v1446_v2 }
  0x14   : > { %s249_s10 = sadd.s32 %s1403_s6, %s1402_s7  ;;  %1316 = vmatprep.subr.bf16.mxu0 %v1449_v5  ;;  %1277 = vmatpush3.bf16.msra.mxu1 %v1460_v6  ;;  %s1146_s7 = sshll.u32 %s1771_s18, 4 }
  0x15   : > { %s1145_s13 = sshll.u32 %s249_s10, 2  ;;  %1338 = vmatprep.subr.bf16.mxu1 %v1470_v16  ;;  %s258_s9 = sadd.s32 %s1147_s8, %s1146_s7 }
  0x16   : > { %s1605_s25 = scalar_lea.vmem %s1752_s0, %s1145_s13  ;;  %s1148_s10 = sshll.u32 %s258_s9, 3 }
  0x17   : > { %v1447_v7 = vld [vmem:[%s1605_s25] sm:$0xff]   ;;  %v1448_v9 = vld [vmem:[%s1605_s25 + $0x8] sm:$0xff]   ;;  %v1450_v10 = vld [vmem:[%s1605_s25 + $0x10] sm:$0xff]   ;;  %s1719_s15 = scalar_lea.vmem %s1757_s5, %s1148_s10 }
  0x18   : > { %1300 = vmatprep.mubr.msk.bf16.mxu0 %vm351_vm0, %v1447_v7  ;;  %1278 = vmatprep.mubr.msk.bf16.mxu1 %vm351_vm0, %v1448_v9  ;;  %v1451_v12 = vld [vmem:[%s1605_s25 + $0x18] sm:$0xff]   ;;  %v1453_v13 = vld [vmem:[%s1605_s25 + $0x20] sm:$0xff]   ;;  %v1454_v14 = vld [vmem:[%s1605_s25 + $0x28] sm:$0xff]  }
  0x19   : > { %1301 = vmatmul.mubr.msk.bf16.vlgmr.msra.gmra.mrb[0].mxu0 %vm351_vm0, %v1448_v9  ;;  %1279 = vmatmul.mubr.msk.bf16.vlgmr.msra.gmra.mrb[0].mxu1 %vm351_vm0, %v1450_v10  ;;  %v1458_v15 = vld [vmem:[%s1605_s25 + $0x30] sm:$0xff]   ;;  %v1459_v19 = vld [vmem:[%s1605_s25 + $0x38] sm:$0xff]   ;;  %v1467_v23 = vld [vmem:[%s1605_s25 + $0x40] sm:$0xff]  }
  0x1a   : > { %1317 = vmatpush3.bf16.msra.mxu0 %v1449_v5  ;;  %1304 = vmatprep.mubr.msk.bf16.mxu0 %vm351_vm0, %v1450_v10  ;;  %v1461_v20 = vld [vmem:[%s1605_s25 + $0x10] sm:$0xff]   ;;  %v1462_v24 = vld [vmem:[%s1605_s25 + $0x18] sm:$0xff]   ;;  %v1463_v25 = vld [vmem:[%s1605_s25 + $0x20] sm:$0xff]  }
  0x1b   : > { %1318 = vmatprep.subr.bf16.mxu0 %v1452_v8  ;;  %1282 = vmatprep.mubr.msk.bf16.mxu1 %vm351_vm0, %v1451_v12  ;;  %v1464_v26 = vld [vmem:[%s1605_s25 + $0x28] sm:$0xff]   ;;  %v1465_v27 = vld [vmem:[%s1605_s25 + $0x30] sm:$0xff]   ;;  %v1466_v28 = vld [vmem:[%s1605_s25 + $0x38] sm:$0xff]  }
  0x1c   : > { %1339 = vmatpush3.bf16.msra.mxu1 %v1470_v16  ;;  %v1468_v29 = vld [vmem:[%s1605_s25 + $0x40] sm:$0xff]   ;;  %v1469_v30 = vld [vmem:[%s1605_s25 + $0x48] sm:$0xff]  }
  0x1d   : > { %1340 = vmatprep.subr.bf16.mxu1 %v1471_v17 }
  0x1e   : > { %1319 = vmatpush3.bf16.msra.mxu0 %v1452_v8 }
  0x1f   : > { %1320 = vmatprep.subr.bf16.mxu0 %v1457_v11 }
  0x20   : > { %1341 = vmatpush3.bf16.msra.mxu1 %v1471_v17 }
  0x21   : > { %1305 = vmatmul.mubr.msk.bf16.gmra.mrb[4].mxu0 %vm351_vm0, %v1451_v12  ;;  %1283 = vmatmul.mubr.msk.bf16.gmra.mrb[4].mxu1 %vm351_vm0, %v1453_v13 }
  0x22   : > { %1308 = vmatprep.mubr.msk.bf16.mxu0 %vm351_vm0, %v1453_v13  ;;  %1321 = vmatpush3.bf16.msra.mxu0 %v1457_v11 }
  0x23   : > { %1286 = vmatprep.mubr.msk.bf16.mxu1 %vm351_vm0, %v1454_v14  ;;  %1342 = vmatprep.subr.bf16.mxu1 %v1472_v18 }
  0x24   : > { %1343 = vmatpush3.bf16.msra.mxu1 %v1472_v18 }
  0x25   : > { %1344 = vmatprep.subr.bf16.mxu1 %v1473_v21 }
  0x28   : > { %1345 = vmatpush3.bf16.msra.mxu1 %v1473_v21 }
  0x29   : > { %1309 = vmatmul.mubr.msk.bf16.gmra.mrb[8].mxu0 %vm351_vm0, %v1454_v14  ;;  %1287 = vmatmul.mubr.msk.bf16.gmra.mrb[8].mxu1 %vm351_vm0, %v1458_v15 }
  0x2a   : > { %1312 = vmatprep.mubr.msk.bf16.mxu0 %vm351_vm0, %v1458_v15  ;;  %1290 = vmatprep.mubr.msk.bf16.mxu1 %vm351_vm0, %v1459_v19 }
  0x2b   : > { %1346 = vmatprep.subr.bf16.mxu1 %v1474_v22 }
  0x2c   : > { %1347 = vmatpush3.bf16.msra.mxu1 %v1474_v22 }
  0x2d   : > { %1348 = vmatprep.subr.bf16.mxu1 %v1475_v31 }
  0x30   : > { %1349 = vmatpush3.bf16.msra.mxu1 %v1475_v31 }
  0x31   : > { %1313 = vmatmul.mubr.msk.bf16.gmra.mrb[12].mxu0 %vm351_vm0, %v1459_v19  ;;  %1291 = vmatmul.mubr.msk.bf16.gmra.mrb[12].mxu1 %vm351_vm0, %v1467_v23 }
  0x32   : > { %1322 = vmatprep.mubr.msk.bf16.mxu0 %vm351_vm0, %v1461_v20  ;;  %1350 = vmatprep.subr.bf16.mxu1 %v1476_v32 }
  0x34   : > { %1351 = vmatpush3.bf16.msra.mxu1 %v1476_v32 }
  0x35   : > { %1352 = vmatprep.subr.bf16.mxu1 %v1477_v33 }
  0x38   : > { %1353 = vmatpush3.bf16.msra.mxu1 %v1477_v33 }
  0x39   : > { %1323 = vmatmul.mubr.msk.bf16.vlgmr.msra.gmra.mrb[0].mxu0 %vm351_vm0, %v1462_v24 }
  0x3a   : > { %1326 = vmatprep.mubr.msk.bf16.mxu0 %vm351_vm0, %v1463_v25 }
  0x41   : > { %1327 = vmatmul.mubr.msk.bf16.gmra.mrb[4].mxu0 %vm351_vm0, %v1464_v26 }
  0x42   : > { %1330 = vmatprep.mubr.msk.bf16.mxu0 %vm351_vm0, %v1465_v27 }
  0x49   : > { %1331 = vmatmul.mubr.msk.bf16.gmra.mrb[8].mxu0 %vm351_vm0, %v1466_v28 }
  0x4a   : > { %1334 = vmatprep.mubr.msk.bf16.mxu0 %vm351_vm0, %v1468_v29 }
  0x51   : > { %1335 = vmatmul.mubr.msk.bf16.gmra.mrb[12].mxu0 %vm351_vm0, %v1469_v30 }
  0xec   : > { %v1280_v34 = vpop.f32.mrb[0].mxu1 }
  0xed   : > { %v410_v35 = vpop.f32.mrb[1].mxu1 }
  0xee   : > { %v1281_v36 = vpop.f32.mrb[2].mxu1 }
  0xef   : > { %v413_v37 = vpop.f32.mrb[3].mxu1 }
  0xf4   : > { %v1284_v38 = vpop.f32.mrb[4].mxu1 }
  0xf5   : > { %v426_v39 = vpop.f32.mrb[5].mxu1 }
  0xf6   : > { %v1285_v40 = vpop.f32.mrb[6].mxu1 }
  0xf7   : > { %v429_v41 = vpop.f32.mrb[7].mxu1 }
  0xfc   : > { %v1288_v42 = vpop.f32.mrb[8].mxu1 }
  0xfd   : > { %v442_v43 = vpop.f32.mrb[9].mxu1 }
  0xfe   : > { %v1289_v44 = vpop.f32.mrb[10].mxu1 }
  0xff   : > { %v445_v45 = vpop.f32.mrb[11].mxu1 }
 0x104   : > { %v1292_v46 = vpop.f32.mrb[12].mxu1 }
 0x105   : > { %v1681_v47 = vpop.f32.mrb[13].mxu1 }
 0x106   : > { %v1688_v50 = vpop.f32.mrb[14].mxu1 }
 0x107   : > { %v1690_v53 = vpop.f32.mrb[15].mxu1 }
 0x10c   : > { %v1324_v48 = vpop.f32.mrb[0].mxu0 }
 0x10d   : > { %v1370_v51 = vadd.f32 %v1324_v48, %v1280_v34  ;;  %v735_v52 = vpop.f32.mrb[1].mxu0 }
 0x10e   : > { %v1371_v54 = vadd.f32 %v735_v52, %v410_v35  ;;  %v1325_v55 = vpop.f32.mrb[2].mxu0 }
 0x10f   : > { %v823_v56 = vadd.f32 %v1370_v51, %v1686_v49  ;;  %v1372_v57 = vadd.f32 %v1325_v55, %v1281_v36  ;;  %v738_v58 = vpop.f32.mrb[3].mxu0 }
 0x110   : > { %v821_v59 = vadd.f32 %v1371_v54, %v1686_v49  ;;  %v1373_v60 = vadd.f32 %v738_v58, %v413_v37 }
 0x111   : > { %v824_v61 = vadd.f32 %v1372_v57, %v1686_v49  ;;  %v839_v63 = vmax.f32 %v823_v56, 0.0 }
 0x112   : > { %v822_v62 = vadd.f32 %v1373_v60, %v1686_v49  ;;  %v837_v1 = vmax.f32 %v821_v59, 0.0 }
 0x113   : > { %v840_v0 = vmax.f32 %v824_v61, 0.0 }
 0x114   : > { %v838_v2 = vmax.f32 %v822_v62, 0.0  ;;  %v1328_v3 = vpop.f32.mrb[4].mxu0 }
 0x115   : > { %v854_v4 = vpack.c.bf16 %v840_v0, %v839_v63  ;;  %v1374_v5 = vadd.f32 %v1328_v3, %v1284_v38  ;;  %v751_v6 = vpop.f32.mrb[5].mxu0 }
 0x116   : > { %v1375_v7 = vadd.f32 %v751_v6, %v426_v39  ;;  %v1329_v8 = vpop.f32.mrb[6].mxu0  ;;  %v853_v9 = vpack.c.bf16 %v838_v2, %v837_v1 }
 0x117   : > { %v827_v10 = vadd.f32 %v1374_v5, %v1686_v49  ;;  %v1376_v11 = vadd.f32 %v1329_v8, %v1285_v40  ;;  %v754_v12 = vpop.f32.mrb[7].mxu0 }
 0x118   : > { %v825_v13 = vadd.f32 %v1375_v7, %v1686_v49  ;;  %v1377_v14 = vadd.f32 %v754_v12, %v429_v41  ;;  %1354 = vmatprep.mubr.bf16.mxu1 %v853_v9 }
 0x119   : > { %v828_v15 = vadd.f32 %v1376_v11, %v1686_v49  ;;  %1355 = vmatmul.mubr.bf16.vlgmr.msra.gmra.mrb[16].mxu1 %v854_v4  ;;  %v843_v17 = vmax.f32 %v827_v10, 0.0 }
 0x11a   : > { %v826_v16 = vadd.f32 %v1377_v14, %v1686_v49  ;;  %v841_v19 = vmax.f32 %v825_v13, 0.0 }
 0x11b   : > { %v844_v18 = vmax.f32 %v828_v15, 0.0 }
 0x11c   : > { %v842_v20 = vmax.f32 %v826_v16, 0.0  ;;  %v1332_v21 = vpop.f32.mrb[8].mxu0 }
 0x11d   : > { %v1378_v22 = vadd.f32 %v1332_v21, %v1288_v42  ;;  %v767_v23 = vpop.f32.mrb[9].mxu0  ;;  %v856_v24 = vpack.c.bf16 %v844_v18, %v843_v17 }
 0x11e   : > { %v1379_v25 = vadd.f32 %v767_v23, %v442_v43  ;;  %v1333_v26 = vpop.f32.mrb[10].mxu0  ;;  %v855_v27 = vpack.c.bf16 %v842_v20, %v841_v19 }
 0x11f   : > { %v831_v28 = vadd.f32 %v1378_v22, %v1686_v49  ;;  %v1380_v29 = vadd.f32 %v1333_v26, %v1289_v44  ;;  %v770_v30 = vpop.f32.mrb[11].mxu0 }
 0x120   : > { %v829_v31 = vadd.f32 %v1379_v25, %v1686_v49  ;;  %v1381_v32 = vadd.f32 %v770_v30, %v445_v45  ;;  %1358 = vmatprep.mubr.bf16.mxu1 %v855_v27 }
 0x121   : > { %v832_v33 = vadd.f32 %v1380_v29, %v1686_v49  ;;  %1359 = vmatmul.mubr.bf16.gmra.mrb[20].mxu1 %v856_v24  ;;  %v847_v35 = vmax.f32 %v831_v28, 0.0 }
 0x122   : > { %v830_v34 = vadd.f32 %v1381_v32, %v1686_v49  ;;  %v845_v37 = vmax.f32 %v829_v31, 0.0 }
 0x123   : > { %v848_v36 = vmax.f32 %v832_v33, 0.0 }
 0x124   : > { %v846_v38 = vmax.f32 %v830_v34, 0.0  ;;  %v1336_v39 = vpop.f32.mrb[12].mxu0 }
 0x125   : > { %v1382_v40 = vadd.f32 %v1336_v39, %v1292_v46  ;;  %v783_v41 = vpop.f32.mrb[13].mxu0  ;;  %v858_v42 = vpack.c.bf16 %v848_v36, %v847_v35 }
 0x126   : > { %v1383_v43 = vadd.f32 %v783_v41, %v1681_v47  ;;  %v1337_v44 = vpop.f32.mrb[14].mxu0  ;;  %v857_v48 = vpack.c.bf16 %v846_v38, %v845_v37 }
 0x127   : > { %v835_v45 = vadd.f32 %v1382_v40, %v1686_v49  ;;  %v1384_v51 = vadd.f32 %v1337_v44, %v1688_v50  ;;  %v786_v52 = vpop.f32.mrb[15].mxu0  ;;  %v1212_v50 = vld [vmem:[%s1756_s4] ss:$0 sm:$0xff] }
 0x128   : > { %v833_v54 = vadd.f32 %v1383_v43, %v1686_v49  ;;  %v1385_v55 = vadd.f32 %v786_v52, %v1690_v53  ;;  %1362 = vmatprep.mubr.bf16.mxu1 %v857_v48 }
 0x129   : > { %v836_v46 = vadd.f32 %v1384_v51, %v1686_v49  ;;  %1363 = vmatmul.mubr.bf16.gmra.mrb[24].mxu1 %v858_v42  ;;  %v851_v47 = vmax.f32 %v835_v45, 0.0 }
 0x12a   : > { %v834_v56 = vadd.f32 %v1385_v55, %v1686_v49  ;;  %v849_v58 = vmax.f32 %v833_v54, 0.0 }
 0x12b   : > { %v852_v57 = vmax.f32 %v836_v46, 0.0 }
 0x12c   : > { %v850_v59 = vmax.f32 %v834_v56, 0.0 }
 0x12d   : > { %v860_v60 = vpack.c.bf16 %v852_v57, %v851_v47 }
 0x12e   : > { %v859_v61 = vpack.c.bf16 %v850_v59, %v849_v58 }
 0x130   : > { %1366 = vmatprep.mubr.bf16.mxu1 %v859_v61 }
 0x131   : > { %1367 = vmatmul.mubr.bf16.gmra.mrb[28].mxu1 %v860_v60 }
 0x1ec   : > { %v1356_v49 = vpop.f32.mrb[16].mxu1 }
 0x1ed   : > { %v975_v53 = vadd.f32 %v1356_v49, %v1212_v50  ;;  %v966_v62 = vpop.f32.mrb[17].mxu1 }
 0x1ee   : > { %v967_v63 = vadd.f32 %v1212_v50, %v966_v62  ;;  %v1357_v0 = vpop.f32.mrb[18].mxu1 }
 0x1ef   : > { %1031 = vst [vmem:[%s1719_s15 + $0x10] sm:$0xff] %v975_v53  ;;  %v978_v1 = vadd.f32 %v1357_v0, %v1212_v50  ;;  %v969_v2 = vpop.f32.mrb[19].mxu1 }
 0x1f0   : > { %1029 = vst [vmem:[%s1719_s15] sm:$0xff] %v967_v63  ;;  %v970_v3 = vadd.f32 %v1212_v50, %v969_v2 }
 0x1f1   : > { %1032 = vst [vmem:[%s1719_s15 + $0x18] sm:$0xff] %v978_v1 }
 0x1f2   : > { %1030 = vst [vmem:[%s1719_s15 + $0x8] sm:$0xff] %v970_v3 }
 0x1f4   : > { %v1360_v4 = vpop.f32.mrb[20].mxu1 }
 0x1f5   : > { %v991_v5 = vadd.f32 %v1360_v4, %v1212_v50  ;;  %v982_v6 = vpop.f32.mrb[21].mxu1 }
 0x1f6   : > { %v983_v7 = vadd.f32 %v1212_v50, %v982_v6  ;;  %v1361_v8 = vpop.f32.mrb[22].mxu1 }
 0x1f7   : > { %1035 = vst [vmem:[%s1719_s15 + $0x30] sm:$0xff] %v991_v5  ;;  %v994_v9 = vadd.f32 %v1361_v8, %v1212_v50  ;;  %v985_v10 = vpop.f32.mrb[23].mxu1 }
 0x1f8   : > { %1033 = vst [vmem:[%s1719_s15 + $0x20] sm:$0xff] %v983_v7  ;;  %v986_v11 = vadd.f32 %v1212_v50, %v985_v10 }
 0x1f9   : > { %1036 = vst [vmem:[%s1719_s15 + $0x38] sm:$0xff] %v994_v9 }
 0x1fa   : > { %1034 = vst [vmem:[%s1719_s15 + $0x28] sm:$0xff] %v986_v11 }
 0x1fc   : > { %v1364_v12 = vpop.f32.mrb[24].mxu1 }
 0x1fd   : > { %v1007_v13 = vadd.f32 %v1364_v12, %v1212_v50  ;;  %v998_v14 = vpop.f32.mrb[25].mxu1 }
 0x1fe   : > { %v999_v15 = vadd.f32 %v1212_v50, %v998_v14  ;;  %v1365_v16 = vpop.f32.mrb[26].mxu1 }
 0x1ff   : > { %1039 = vst [vmem:[%s1719_s15 + $0x50] sm:$0xff] %v1007_v13  ;;  %v1010_v17 = vadd.f32 %v1365_v16, %v1212_v50  ;;  %v1001_v18 = vpop.f32.mrb[27].mxu1 }
 0x200   : > { %1037 = vst [vmem:[%s1719_s15 + $0x40] sm:$0xff] %v999_v15  ;;  %v1002_v19 = vadd.f32 %v1212_v50, %v1001_v18 }
 0x201   : > { %1040 = vst [vmem:[%s1719_s15 + $0x58] sm:$0xff] %v1010_v17 }
 0x202   : > { %1038 = vst [vmem:[%s1719_s15 + $0x48] sm:$0xff] %v1002_v19 }
 0x204   : > { %v1368_v20 = vpop.f32.mrb[28].mxu1 }
 0x205   : > { %v1023_v21 = vadd.f32 %v1368_v20, %v1212_v50  ;;  %v1014_v22 = vpop.f32.mrb[29].mxu1 }
 0x206   : > { %v1015_v23 = vadd.f32 %v1212_v50, %v1014_v22  ;;  %v1369_v24 = vpop.f32.mrb[30].mxu1 }
 0x207   : > { %1043 = vst [vmem:[%s1719_s15 + $0x70] sm:$0xff] %v1023_v21  ;;  %v1026_v25 = vadd.f32 %v1369_v24, %v1212_v50  ;;  %v1017_v26 = vpop.f32.mrb[31].mxu1 }
 0x208   : > { %1041 = vst [vmem:[%s1719_s15 + $0x60] sm:$0xff] %v1015_v23  ;;  %v1018_v27 = vadd.f32 %v1212_v50, %v1017_v26 }
 0x209   : > { %1044 = vst [vmem:[%s1719_s15 + $0x78] sm:$0xff] %v1026_v25 }
 0x20a   : > { %1042 = vst [vmem:[%s1719_s15 + $0x68] sm:$0xff] %v1018_v27 }
 0x20b PF: > { %s15_s22 = sadd.s32 1, %s1516_s22   ;;  %s1758_s18 = smov %s1508_s20 }
 0x20c   : > { %p12_p7 = scmp.ge.s32.totalorder %s15_s22, 6   ;;  %s1759_s19 = smov %s1512_s21 }
 0x20d   : > { %s1760_s20 = smov %s1763_s23  ;;  %s1761_s21 = smov %s1767_s24 }
 0x20e   :  { %14 = sbr.rel (!%p12_p7) target bundleno = 3 (0x3), region = 72 }

// kernel: _fcn_head_call.1
= control target key start
LH: loop header
LB: loop body
LE: loop exit
PB: predicated region body
PF: predicated region fallthrough
CT: control target
= control target key end

     0   :  { %s1548_s18 = smov 0   ;;  %s1550_s19 = smov 0   ;;  %s1752_s0 = inlined_call_operand.vmem [shape: bf16[2,2,160,48], index: 0, kind: input, shape index: {}]   ;;  %s1753_s1 = inlined_call_operand.vmem [shape: bf16[3,48,128], index: 1, kind: input, shape index: {}]   ;;  %s1754_s2 = inlined_call_operand.vmem [shape: f32[1,128], index: 2, kind: input, shape index: {}]   ;;  %s1755_s3 = inlined_call_operand.vmem [shape: bf16[128,128], index: 3, kind: input, shape index: {}]   ;;  %s1756_s4 = inlined_call_operand.vmem [shape: f32[1,128], index: 4, kind: input, shape index: {}]   ;;  %s1757_s5 = inlined_call_operand.vmem [shape: f32[2,2,128,128], index: 5, kind: output, shape index: {}]  }
   0x1   :  { %s1552_s20 = smov 0   ;;  %s1554_s21 = smov 0  }
   0x2   :  { %s1556_s22 = smov 0  }
   0x3 LB: > { %s24_s23 = sadd.s32 1, %s1508_s20  ;;  %s27_s24 = sadd.s32 1, %s1512_s21  ;;  %s1516_s22 = sphi %s1556_s22, %s15_s22   ;;  %s1512_s21 = sphi %s1554_s21, %s1761_s21   ;;  %s1508_s20 = sphi %s1552_s20, %s1760_s20   ;;  %s1504_s19 = sphi %s1550_s19, %s1759_s19   ;;  %s1500_s18 = sphi %s1548_s18, %s1758_s18  }
   0x4   : > { %p25_p0 = scmp.ge.s32.totalorder %s24_s23, 2  ;;  %p1144_p1 = scmp.ge.s32.totalorder %s1516_s22, 1 }
   0x5   : > { %p207_p2 = scmp.lt.s32.totalorder %s1516_s22, 5 }
   0x6   : > { %s1763_s23 = smov (%p25_p0, %s24_s23), 0  ;;  %s1765_s24 = smov (!%p25_p0, %s27_s24), %s1512_s21 }
   0x7   : > { %p208_p3 = pnand %p1144_p1, %p207_p2  ;;  %p29_p4 = scmp.ge.s32.totalorder %s1765_s24, 2 }
   0x8   : > { %v1444_v0 = vld [vmem:[%s1753_s1] sm:$0xff] (!%p208_p3)   ;;  %p243_p5 = scmp.lt.s32.totalorder (!%p208_p3), %s1504_s19, 1  ;;  %v1445_v1 = vld [vmem:[%s1753_s1 + $0x8] sm:$0xff] (!%p208_p3)   ;;  %p245_p6 = scmp.lt.s32.totalorder (!%p208_p3), %s1500_s18, 1  ;;  %v1446_v2 = vld [vmem:[%s1753_s1 + $0x10] sm:$0xff] (!%p208_p3)   ;;  %vm351_vm0 = vcmask (!%p208_p3), 392192  }
   0x9   : > { %s1767_s24 = smov (%p29_p4, %s1765_s24), 0  ;;  %211 = sbr.rel (%p208_p3) target bundleno = 523 (0x20b), region = 40 }
   0xa   : > { %1294 = vmatprep.subr.bf16.mxu0 (!%p208_p3), %v1444_v0  ;;  %v1455_v3 = vld [vmem:[%s1753_s1 + $0x18] sm:$0xff] (!%p208_p3)   ;;  %v1456_v4 = vld [vmem:[%s1753_s1 + $0x20] sm:$0xff] (!%p208_p3)   ;;  %v1449_v5 = vld [vmem:[%s1753_s1 + $0x30] sm:$0xff] (!%p208_p3)  }
   0xb   : > { %1295 = vmatpush3.bf16.msra.mxu0 (!%p208_p3), %v1444_v0  ;;  %1272 = vmatprep.subr.bf16.mxu1 (!%p208_p3), %v1455_v3  ;;  %v1460_v6 = vld [vmem:[%s1753_s1 + $0x28] sm:$0xff] (!%p208_p3)   ;;  %v1452_v8 = vld [vmem:[%s1753_s1 + $0x38] sm:$0xff] (!%p208_p3)   ;;  %v1457_v11 = vld [vmem:[%s1753_s1 + $0x40] sm:$0xff] (!%p208_p3)  }
   0xc   : > { %1296 = vmatprep.subr.bf16.mxu0 (!%p208_p3), %v1445_v1  ;;  %1273 = vmatpush3.bf16.msra.mxu1 (!%p208_p3), %v1455_v3  ;;  %v1470_v16 = vld [vmem:[%s1755_s3] sm:$0xff] (!%p208_p3)   ;;  %v1471_v17 = vld [vmem:[%s1755_s3 + $0x8] sm:$0xff] (!%p208_p3)   ;;  %v1472_v18 = vld [vmem:[%s1755_s3 + $0x10] sm:$0xff] (!%p208_p3)  }
   0xd   : > { %1274 = vmatprep.subr.bf16.mxu1 (!%p208_p3), %v1456_v4  ;;  %v1473_v21 = vld [vmem:[%s1755_s3 + $0x18] sm:$0xff] (!%p208_p3)   ;;  %v1474_v22 = vld [vmem:[%s1755_s3 + $0x20] sm:$0xff] (!%p208_p3)   ;;  %v1475_v31 = vld [vmem:[%s1755_s3 + $0x28] sm:$0xff] (!%p208_p3)  }
   0xe   : > { %v1476_v32 = vld [vmem:[%s1755_s3 + $0x30] sm:$0xff] (!%p208_p3)   ;;  %v1477_v33 = vld [vmem:[%s1755_s3 + $0x38] sm:$0xff] (!%p208_p3)   ;;  %v1686_v49 = vld [vmem:[%s1754_s2] ss:$0 sm:$0xff] (!%p208_p3) }
   0xf   : > { %1297 = vmatpush3.bf16.msra.mxu0 (!%p208_p3), %v1445_v1 }
  0x10   : > { %s1769_s19 = smov (!%p243_p5, %s1504_s19), 1  ;;  %s1771_s18 = smov (!%p245_p6, %s1500_s18), 1  ;;  %1298 = vmatprep.subr.bf16.mxu0 %v1446_v2  ;;  %1275 = vmatpush3.bf16.msra.mxu1 %v1456_v4 }
  0x11   : > { %s1403_s6 = smul.u32 40, %s1769_s19  ;;  %1276 = vmatprep.subr.bf16.mxu1 %v1460_v6  ;;  %s1147_s8 = sshll.u32 %s1769_s19, 5 }
  0x12   : > { %s1402_s7 = smul.u32 20, %s1771_s18 }
  0x13   : > { %1299 = vmatpush3.bf16.msra.mxu0 %v1446_v2 }
  0x14   : > { %s249_s10 = sadd.s32 %s1403_s6, %s1402_s7  ;;  %1316 = vmatprep.subr.bf16.mxu0 %v1449_v5  ;;  %1277 = vmatpush3.bf16.msra.mxu1 %v1460_v6  ;;  %s1146_s7 = sshll.u32 %s1771_s18, 4 }
  0x15   : > { %s1145_s13 = sshll.u32 %s249_s10, 2  ;;  %1338 = vmatprep.subr.bf16.mxu1 %v1470_v16  ;;  %s258_s9 = sadd.s32 %s1147_s8, %s1146_s7 }
  0x16   : > { %s1605_s25 = scalar_lea.vmem %s1752_s0, %s1145_s13  ;;  %s1148_s10 = sshll.u32 %s258_s9, 3 }
  0x17   : > { %v1447_v7 = vld [vmem:[%s1605_s25] sm:$0xff]   ;;  %v1448_v9 = vld [vmem:[%s1605_s25 + $0x8] sm:$0xff]   ;;  %v1450_v10 = vld [vmem:[%s1605_s25 + $0x10] sm:$0xff]   ;;  %s1719_s15 = scalar_lea.vmem %s1757_s5, %s1148_s10 }
  0x18   : > { %1300 = vmatprep.mubr.msk.bf16.mxu0 %vm351_vm0, %v1447_v7  ;;  %1278 = vmatprep.mubr.msk.bf16.mxu1 %vm351_vm0, %v1448_v9  ;;  %v1451_v12 = vld [vmem:[%s1605_s25 + $0x18] sm:$0xff]   ;;  %v1453_v13 = vld [vmem:[%s1605_s25 + $0x20] sm:$0xff]   ;;  %v1454_v14 = vld [vmem:[%s1605_s25 + $0x28] sm:$0xff]  }
  0x19   : > { %1301 = vmatmul.mubr.msk.bf16.vlgmr.msra.gmra.mrb[0].mxu0 %vm351_vm0, %v1448_v9  ;;  %1279 = vmatmul.mubr.msk.bf16.vlgmr.msra.gmra.mrb[0].mxu1 %vm351_vm0, %v1450_v10  ;;  %v1458_v15 = vld [vmem:[%s1605_s25 + $0x30] sm:$0xff]   ;;  %v1459_v19 = vld [vmem:[%s1605_s25 + $0x38] sm:$0xff]   ;;  %v1467_v23 = vld [vmem:[%s1605_s25 + $0x40] sm:$0xff]  }
  0x1a   : > { %1317 = vmatpush3.bf16.msra.mxu0 %v1449_v5  ;;  %1304 = vmatprep.mubr.msk.bf16.mxu0 %vm351_vm0, %v1450_v10  ;;  %v1461_v20 = vld [vmem:[%s1605_s25 + $0x10] sm:$0xff]   ;;  %v1462_v24 = vld [vmem:[%s1605_s25 + $0x18] sm:$0xff]   ;;  %v1463_v25 = vld [vmem:[%s1605_s25 + $0x20] sm:$0xff]  }
  0x1b   : > { %1318 = vmatprep.subr.bf16.mxu0 %v1452_v8  ;;  %1282 = vmatprep.mubr.msk.bf16.mxu1 %vm351_vm0, %v1451_v12  ;;  %v1464_v26 = vld [vmem:[%s1605_s25 + $0x28] sm:$0xff]   ;;  %v1465_v27 = vld [vmem:[%s1605_s25 + $0x30] sm:$0xff]   ;;  %v1466_v28 = vld [vmem:[%s1605_s25 + $0x38] sm:$0xff]  }
  0x1c   : > { %1339 = vmatpush3.bf16.msra.mxu1 %v1470_v16  ;;  %v1468_v29 = vld [vmem:[%s1605_s25 + $0x40] sm:$0xff]   ;;  %v1469_v30 = vld [vmem:[%s1605_s25 + $0x48] sm:$0xff]  }
  0x1d   : > { %1340 = vmatprep.subr.bf16.mxu1 %v1471_v17 }
  0x1e   : > { %1319 = vmatpush3.bf16.msra.mxu0 %v1452_v8 }
  0x1f   : > { %1320 = vmatprep.subr.bf16.mxu0 %v1457_v11 }
  0x20   : > { %1341 = vmatpush3.bf16.msra.mxu1 %v1471_v17 }
  0x21   : > { %1305 = vmatmul.mubr.msk.bf16.gmra.mrb[4].mxu0 %vm351_vm0, %v1451_v12  ;;  %1283 = vmatmul.mubr.msk.bf16.gmra.mrb[4].mxu1 %vm351_vm0, %v1453_v13 }
  0x22   : > { %1308 = vmatprep.mubr.msk.bf16.mxu0 %vm351_vm0, %v1453_v13  ;;  %1321 = vmatpush3.bf16.msra.mxu0 %v1457_v11 }
  0x23   : > { %1286 = vmatprep.mubr.msk.bf16.mxu1 %vm351_vm0, %v1454_v14  ;;  %1342 = vmatprep.subr.bf16.mxu1 %v1472_v18 }
  0x24   : > { %1343 = vmatpush3.bf16.msra.mxu1 %v1472_v18 }
  0x25   : > { %1344 = vmatprep.subr.bf16.mxu1 %v1473_v21 }
  0x28   : > { %1345 = vmatpush3.bf16.msra.mxu1 %v1473_v21 }
  0x29   : > { %1309 = vmatmul.mubr.msk.bf16.gmra.mrb[8].mxu0 %vm351_vm0, %v1454_v14  ;;  %1287 = vmatmul.mubr.msk.bf16.gmra.mrb[8].mxu1 %vm351_vm0, %v1458_v15 }
  0x2a   : > { %1312 = vmatprep.mubr.msk.bf16.mxu0 %vm351_vm0, %v1458_v15  ;;  %1290 = vmatprep.mubr.msk.bf16.mxu1 %vm351_vm0, %v1459_v19 }
  0x2b   : > { %1346 = vmatprep.subr.bf16.mxu1 %v1474_v22 }
  0x2c   : > { %1347 = vmatpush3.bf16.msra.mxu1 %v1474_v22 }
  0x2d   : > { %1348 = vmatprep.subr.bf16.mxu1 %v1475_v31 }
  0x30   : > { %1349 = vmatpush3.bf16.msra.mxu1 %v1475_v31 }
  0x31   : > { %1313 = vmatmul.mubr.msk.bf16.gmra.mrb[12].mxu0 %vm351_vm0, %v1459_v19  ;;  %1291 = vmatmul.mubr.msk.bf16.gmra.mrb[12].mxu1 %vm351_vm0, %v1467_v23 }
  0x32   : > { %1322 = vmatprep.mubr.msk.bf16.mxu0 %vm351_vm0, %v1461_v20  ;;  %1350 = vmatprep.subr.bf16.mxu1 %v1476_v32 }
  0x34   : > { %1351 = vmatpush3.bf16.msra.mxu1 %v1476_v32 }
  0x35   : > { %1352 = vmatprep.subr.bf16.mxu1 %v1477_v33 }
  0x38   : > { %1353 = vmatpush3.bf16.msra.mxu1 %v1477_v33 }
  0x39   : > { %1323 = vmatmul.mubr.msk.bf16.vlgmr.msra.gmra.mrb[0].mxu0 %vm351_vm0, %v1462_v24 }
  0x3a   : > { %1326 = vmatprep.mubr.msk.bf16.mxu0 %vm351_vm0, %v1463_v25 }
  0x41   : > { %1327 = vmatmul.mubr.msk.bf16.gmra.mrb[4].mxu0 %vm351_vm0, %v1464_v26 }
  0x42   : > { %1330 = vmatprep.mubr.msk.bf16.mxu0 %vm351_vm0, %v1465_v27 }
  0x49   : > { %1331 = vmatmul.mubr.msk.bf16.gmra.mrb[8].mxu0 %vm351_vm0, %v1466_v28 }
  0x4a   : > { %1334 = vmatprep.mubr.msk.bf16.mxu0 %vm351_vm0, %v1468_v29 }
  0x51   : > { %1335 = vmatmul.mubr.msk.bf16.gmra.mrb[12].mxu0 %vm351_vm0, %v1469_v30 }
  0xec   : > { %v1280_v34 = vpop.f32.mrb[0].mxu1 }
  0xed   : > { %v410_v35 = vpop.f32.mrb[1].mxu1 }
  0xee   : > { %v1281_v36 = vpop.f32.mrb[2].mxu1 }
  0xef   : > { %v413_v37 = vpop.f32.mrb[3].mxu1 }
  0xf4   : > { %v1284_v38 = vpop.f32.mrb[4].mxu1 }
  0xf5   : > { %v426_v39 = vpop.f32.mrb[5].mxu1 }
  0xf6   : > { %v1285_v40 = vpop.f32.mrb[6].mxu1 }
  0xf7   : > { %v429_v41 = vpop.f32.mrb[7].mxu1 }
  0xfc   : > { %v1288_v42 = vpop.f32.mrb[8].mxu1 }
  0xfd   : > { %v442_v43 = vpop.f32.mrb[9].mxu1 }
  0xfe   : > { %v1289_v44 = vpop.f32.mrb[10].mxu1 }
  0xff   : > { %v445_v45 = vpop.f32.mrb[11].mxu1 }
 0x104   : > { %v1292_v46 = vpop.f32.mrb[12].mxu1 }
 0x105   : > { %v1681_v47 = vpop.f32.mrb[13].mxu1 }
 0x106   : > { %v1688_v50 = vpop.f32.mrb[14].mxu1 }
 0x107   : > { %v1690_v53 = vpop.f32.mrb[15].mxu1 }
 0x10c   : > { %v1324_v48 = vpop.f32.mrb[0].mxu0 }
 0x10d   : > { %v1370_v51 = vadd.f32 %v1324_v48, %v1280_v34  ;;  %v735_v52 = vpop.f32.mrb[1].mxu0 }
 0x10e   : > { %v1371_v54 = vadd.f32 %v735_v52, %v410_v35  ;;  %v1325_v55 = vpop.f32.mrb[2].mxu0 }
 0x10f   : > { %v823_v56 = vadd.f32 %v1370_v51, %v1686_v49  ;;  %v1372_v57 = vadd.f32 %v1325_v55, %v1281_v36  ;;  %v738_v58 = vpop.f32.mrb[3].mxu0 }
 0x110   : > { %v821_v59 = vadd.f32 %v1371_v54, %v1686_v49  ;;  %v1373_v60 = vadd.f32 %v738_v58, %v413_v37 }
 0x111   : > { %v824_v61 = vadd.f32 %v1372_v57, %v1686_v49  ;;  %v839_v63 = vmax.f32 %v823_v56, 0.0 }
 0x112   : > { %v822_v62 = vadd.f32 %v1373_v60, %v1686_v49  ;;  %v837_v1 = vmax.f32 %v821_v59, 0.0 }
 0x113   : > { %v840_v0 = vmax.f32 %v824_v61, 0.0 }
 0x114   : > { %v838_v2 = vmax.f32 %v822_v62, 0.0  ;;  %v1328_v3 = vpop.f32.mrb[4].mxu0 }
 0x115   : > { %v854_v4 = vpack.c.bf16 %v840_v0, %v839_v63  ;;  %v1374_v5 = vadd.f32 %v1328_v3, %v1284_v38  ;;  %v751_v6 = vpop.f32.mrb[5].mxu0 }
 0x116   : > { %v1375_v7 = vadd.f32 %v751_v6, %v426_v39  ;;  %v1329_v8 = vpop.f32.mrb[6].mxu0  ;;  %v853_v9 = vpack.c.bf16 %v838_v2, %v837_v1 }
 0x117   : > { %v827_v10 = vadd.f32 %v1374_v5, %v1686_v49  ;;  %v1376_v11 = vadd.f32 %v1329_v8, %v1285_v40  ;;  %v754_v12 = vpop.f32.mrb[7].mxu0 }
 0x118   : > { %v825_v13 = vadd.f32 %v1375_v7, %v1686_v49  ;;  %v1377_v14 = vadd.f32 %v754_v12, %v429_v41  ;;  %1354 = vmatprep.mubr.bf16.mxu1 %v853_v9 }
 0x119   : > { %v828_v15 = vadd.f32 %v1376_v11, %v1686_v49  ;;  %1355 = vmatmul.mubr.bf16.vlgmr.msra.gmra.mrb[16].mxu1 %v854_v4  ;;  %v843_v17 = vmax.f32 %v827_v10, 0.0 }
 0x11a   : > { %v826_v16 = vadd.f32 %v1377_v14, %v1686_v49  ;;  %v841_v19 = vmax.f32 %v825_v13, 0.0 }
 0x11b   : > { %v844_v18 = vmax.f32 %v828_v15, 0.0 }
 0x11c   : > { %v842_v20 = vmax.f32 %v826_v16, 0.0  ;;  %v1332_v21 = vpop.f32.mrb[8].mxu0 }
 0x11d   : > { %v1378_v22 = vadd.f32 %v1332_v21, %v1288_v42  ;;  %v767_v23 = vpop.f32.mrb[9].mxu0  ;;  %v856_v24 = vpack.c.bf16 %v844_v18, %v843_v17 }
 0x11e   : > { %v1379_v25 = vadd.f32 %v767_v23, %v442_v43  ;;  %v1333_v26 = vpop.f32.mrb[10].mxu0  ;;  %v855_v27 = vpack.c.bf16 %v842_v20, %v841_v19 }
 0x11f   : > { %v831_v28 = vadd.f32 %v1378_v22, %v1686_v49  ;;  %v1380_v29 = vadd.f32 %v1333_v26, %v1289_v44  ;;  %v770_v30 = vpop.f32.mrb[11].mxu0 }
 0x120   : > { %v829_v31 = vadd.f32 %v1379_v25, %v1686_v49  ;;  %v1381_v32 = vadd.f32 %v770_v30, %v445_v45  ;;  %1358 = vmatprep.mubr.bf16.mxu1 %v855_v27 }
 0x121   : > { %v832_v33 = vadd.f32 %v1380_v29, %v1686_v49  ;;  %1359 = vmatmul.mubr.bf16.gmra.mrb[20].mxu1 %v856_v24  ;;  %v847_v35 = vmax.f32 %v831_v28, 0.0 }
 0x122   : > { %v830_v34 = vadd.f32 %v1381_v32, %v1686_v49  ;;  %v845_v37 = vmax.f32 %v829_v31, 0.0 }
 0x123   : > { %v848_v36 = vmax.f32 %v832_v33, 0.0 }
 0x124   : > { %v846_v38 = vmax.f32 %v830_v34, 0.0  ;;  %v1336_v39 = vpop.f32.mrb[12].mxu0 }
 0x125   : > { %v1382_v40 = vadd.f32 %v1336_v39, %v1292_v46  ;;  %v783_v41 = vpop.f32.mrb[13].mxu0  ;;  %v858_v42 = vpack.c.bf16 %v848_v36, %v847_v35 }
 0x126   : > { %v1383_v43 = vadd.f32 %v783_v41, %v1681_v47  ;;  %v1337_v44 = vpop.f32.mrb[14].mxu0  ;;  %v857_v48 = vpack.c.bf16 %v846_v38, %v845_v37 }
 0x127   : > { %v835_v45 = vadd.f32 %v1382_v40, %v1686_v49  ;;  %v1384_v51 = vadd.f32 %v1337_v44, %v1688_v50  ;;  %v786_v52 = vpop.f32.mrb[15].mxu0  ;;  %v1212_v50 = vld [vmem:[%s1756_s4] ss:$0 sm:$0xff] }
 0x128   : > { %v833_v54 = vadd.f32 %v1383_v43, %v1686_v49  ;;  %v1385_v55 = vadd.f32 %v786_v52, %v1690_v53  ;;  %1362 = vmatprep.mubr.bf16.mxu1 %v857_v48 }
 0x129   : > { %v836_v46 = vadd.f32 %v1384_v51, %v1686_v49  ;;  %1363 = vmatmul.mubr.bf16.gmra.mrb[24].mxu1 %v858_v42  ;;  %v851_v47 = vmax.f32 %v835_v45, 0.0 }
 0x12a   : > { %v834_v56 = vadd.f32 %v1385_v55, %v1686_v49  ;;  %v849_v58 = vmax.f32 %v833_v54, 0.0 }
 0x12b   : > { %v852_v57 = vmax.f32 %v836_v46, 0.0 }
 0x12c   : > { %v850_v59 = vmax.f32 %v834_v56, 0.0 }
 0x12d   : > { %v860_v60 = vpack.c.bf16 %v852_v57, %v851_v47 }
 0x12e   : > { %v859_v61 = vpack.c.bf16 %v850_v59, %v849_v58 }
 0x130   : > { %1366 = vmatprep.mubr.bf16.mxu1 %v859_v61 }
 0x131   : > { %1367 = vmatmul.mubr.bf16.gmra.mrb[28].mxu1 %v860_v60 }
 0x1ec   : > { %v1356_v49 = vpop.f32.mrb[16].mxu1 }
 0x1ed   : > { %v975_v53 = vadd.f32 %v1356_v49, %v1212_v50  ;;  %v966_v62 = vpop.f32.mrb[17].mxu1 }
 0x1ee   : > { %v967_v63 = vadd.f32 %v1212_v50, %v966_v62  ;;  %v1357_v0 = vpop.f32.mrb[18].mxu1 }
 0x1ef   : > { %1031 = vst [vmem:[%s1719_s15 + $0x10] sm:$0xff] %v975_v53  ;;  %v978_v1 = vadd.f32 %v1357_v0, %v1212_v50  ;;  %v969_v2 = vpop.f32.mrb[19].mxu1 }
 0x1f0   : > { %1029 = vst [vmem:[%s1719_s15] sm:$0xff] %v967_v63  ;;  %v970_v3 = vadd.f32 %v1212_v50, %v969_v2 }
 0x1f1   : > { %1032 = vst [vmem:[%s1719_s15 + $0x18] sm:$0xff] %v978_v1 }
 0x1f2   : > { %1030 = vst [vmem:[%s1719_s15 + $0x8] sm:$0xff] %v970_v3 }
 0x1f4   : > { %v1360_v4 = vpop.f32.mrb[20].mxu1 }
 0x1f5   : > { %v991_v5 = vadd.f32 %v1360_v4, %v1212_v50  ;;  %v982_v6 = vpop.f32.mrb[21].mxu1 }
 0x1f6   : > { %v983_v7 = vadd.f32 %v1212_v50, %v982_v6  ;;  %v1361_v8 = vpop.f32.mrb[22].mxu1 }
 0x1f7   : > { %1035 = vst [vmem:[%s1719_s15 + $0x30] sm:$0xff] %v991_v5  ;;  %v994_v9 = vadd.f32 %v1361_v8, %v1212_v50  ;;  %v985_v10 = vpop.f32.mrb[23].mxu1 }
 0x1f8   : > { %1033 = vst [vmem:[%s1719_s15 + $0x20] sm:$0xff] %v983_v7  ;;  %v986_v11 = vadd.f32 %v1212_v50, %v985_v10 }
 0x1f9   : > { %1036 = vst [vmem:[%s1719_s15 + $0x38] sm:$0xff] %v994_v9 }
 0x1fa   : > { %1034 = vst [vmem:[%s1719_s15 + $0x28] sm:$0xff] %v986_v11 }
 0x1fc   : > { %v1364_v12 = vpop.f32.mrb[24].mxu1 }
 0x1fd   : > { %v1007_v13 = vadd.f32 %v1364_v12, %v1212_v50  ;;  %v998_v14 = vpop.f32.mrb[25].mxu1 }
 0x1fe   : > { %v999_v15 = vadd.f32 %v1212_v50, %v998_v14  ;;  %v1365_v16 = vpop.f32.mrb[26].mxu1 }
 0x1ff   : > { %1039 = vst [vmem:[%s1719_s15 + $0x50] sm:$0xff] %v1007_v13  ;;  %v1010_v17 = vadd.f32 %v1365_v16, %v1212_v50  ;;  %v1001_v18 = vpop.f32.mrb[27].mxu1 }
 0x200   : > { %1037 = vst [vmem:[%s1719_s15 + $0x40] sm:$0xff] %v999_v15  ;;  %v1002_v19 = vadd.f32 %v1212_v50, %v1001_v18 }
 0x201   : > { %1040 = vst [vmem:[%s1719_s15 + $0x58] sm:$0xff] %v1010_v17 }
 0x202   : > { %1038 = vst [vmem:[%s1719_s15 + $0x48] sm:$0xff] %v1002_v19 }
 0x204   : > { %v1368_v20 = vpop.f32.mrb[28].mxu1 }
 0x205   : > { %v1023_v21 = vadd.f32 %v1368_v20, %v1212_v50  ;;  %v1014_v22 = vpop.f32.mrb[29].mxu1 }
 0x206   : > { %v1015_v23 = vadd.f32 %v1212_v50, %v1014_v22  ;;  %v1369_v24 = vpop.f32.mrb[30].mxu1 }
 0x207   : > { %1043 = vst [vmem:[%s1719_s15 + $0x70] sm:$0xff] %v1023_v21  ;;  %v1026_v25 = vadd.f32 %v1369_v24, %v1212_v50  ;;  %v1017_v26 = vpop.f32.mrb[31].mxu1 }
 0x208   : > { %1041 = vst [vmem:[%s1719_s15 + $0x60] sm:$0xff] %v1015_v23  ;;  %v1018_v27 = vadd.f32 %v1212_v50, %v1017_v26 }
 0x209   : > { %1044 = vst [vmem:[%s1719_s15 + $0x78] sm:$0xff] %v1026_v25 }
 0x20a   : > { %1042 = vst [vmem:[%s1719_s15 + $0x68] sm:$0xff] %v1018_v27 }
 0x20b PF: > { %s15_s22 = sadd.s32 1, %s1516_s22   ;;  %s1758_s18 = smov %s1508_s20 }
 0x20c   : > { %p12_p7 = scmp.ge.s32.totalorder %s15_s22, 6   ;;  %s1759_s19 = smov %s1512_s21 }
 0x20d   : > { %s1760_s20 = smov %s1763_s23  ;;  %s1761_s21 = smov %s1767_s24 }
 0x20e   :  { %14 = sbr.rel (!%p12_p7) target bundleno = 3 (0x3), region = 72 }

</bundles_post_ra>
